<compile_context>
chip_gen: v6e
topology: v6e:2x2x1
jax: 0.10.0
libtpu: 0.0.40
codegen_flags: <defaults>
</compile_context>

<pallas_src>
import jax
import jax.numpy as jnp
from jax.experimental import pallas as pl
from jax.experimental.pallas import tpu as pltpu


def _round_up(x, m):
    return (x + m - 1) // m * m


def dueling_dqn_kernel(x_ref,
                       w1_ref, b1_ref,
                       wva1_ref, bva1_ref,
                       wq_ref, bq_ref,
                       q_ref):
    # x tile: (TILE_B, F) bf16
    x = x_ref[...]

    # Shared layer: Linear + ReLU (+ Dropout == identity in eval mode).
    h = jnp.dot(x, w1_ref[...], preferred_element_type=jnp.float32) + b1_ref[...]
    h = jnp.maximum(h, 0.0)

    # Fused value|advantage hidden layer: one (H, 2H) matmul, then ReLU.
    hva = jnp.dot(h.astype(wva1_ref.dtype), wva1_ref[...],
                  preferred_element_type=jnp.float32) + bva1_ref[...]
    hva = jnp.maximum(hva, 0.0)

    # Fused, lane-dense output matmul. wq/bq already fold the dueling combine
    # Q = V + A - mean(A), so this single dot produces padded Q directly.
    q = jnp.dot(hva.astype(wq_ref.dtype), wq_ref[...],
                preferred_element_type=jnp.float32) + bq_ref[...]
    q_ref[...] = q.astype(q_ref.dtype)


def dueling_dqn_forward(features, kparams, *, tile_b=256):
    """features: (B, feature_dim) float32. kparams: output of pack_kernel_params."""
    B, F = features.shape
    w1, b1 = kparams["w1"], kparams["b1"]
    wva1, bva1 = kparams["wva1"], kparams["bva1"]
    wq, bq = kparams["wq"], kparams["bq"]
    A = kparams["action_space_size"]
    H1 = w1.shape[1]
    H2x2 = wva1.shape[1]
    P = wq.shape[1]  # lane-padded output width (multiple of 128)

    # Pick the batch tile: multiple of 8 sublanes, capped so small batches do
    # not over-pad. TILE_B=256 keeps VMEM use tiny even under v7x's 64 MiB.
    tile_b = min(tile_b, _round_up(B, 8))
    b_pad = _round_up(B, tile_b)

    x = features.astype(jnp.bfloat16)
    if b_pad != B:
        x = jnp.pad(x, ((0, b_pad - B), (0, 0)))

    grid = (b_pad // tile_b,)

    in_specs = [
        pl.BlockSpec((tile_b, F), lambda i: (i, 0)),      # x: tiled over batch
        pl.BlockSpec(w1.shape, lambda i: (0, 0)),         # weights: resident
        pl.BlockSpec(b1.shape, lambda i: (0, 0)),
        pl.BlockSpec(wva1.shape, lambda i: (0, 0)),
        pl.BlockSpec(bva1.shape, lambda i: (0, 0)),
        pl.BlockSpec(wq.shape, lambda i: (0, 0)),
        pl.BlockSpec(bq.shape, lambda i: (0, 0)),
    ]
    out_specs = pl.BlockSpec((tile_b, P), lambda i: (i, 0))

    flops = 2 * b_pad * (F * H1 + H1 * H2x2 + H2x2 * P)
    bytes_accessed = (
        x.size * x.dtype.itemsize
        + sum(a.size * a.dtype.itemsize for a in (w1, b1, wva1, bva1, wq, bq))
        + b_pad * P * 4)
    cost = pl.CostEstimate(flops=flops, transcendentals=0,
                           bytes_accessed=bytes_accessed)

    q_pad = pl.pallas_call(
        dueling_dqn_kernel,
        out_shape=jax.ShapeDtypeStruct((b_pad, P), jnp.float32),
        grid=grid,
        in_specs=in_specs,
        out_specs=out_specs,
        compiler_params=pltpu.CompilerParams(
            dimension_semantics=("parallel",)),
        cost_estimate=cost,
    )(x, w1, b1, wva1, bva1, wq, bq)

    return q_pad[:B, :A]


def orthogonal_linear(key, in_dim, out_dim):
    """Orthogonal init (gain=1.0) in (in, out) layout; zero bias shaped (1, out)."""
    w = jax.nn.initializers.orthogonal(scale=1.0)(key, (out_dim, in_dim), jnp.float32)
    return w.T, jnp.zeros((1, out_dim), jnp.float32)


def make_params(key, feature_dim, action_space_size, hidden_dims=(256, 256)):
    assert len(hidden_dims) == 2, "only one shared layer (default config) supported"
    ks = jax.random.split(key, 5)
    h_shared, h_last = hidden_dims[0], hidden_dims[-1]
    w1, b1 = orthogonal_linear(ks[0], feature_dim, h_shared)
    wv1, bv1 = orthogonal_linear(ks[1], h_shared, h_last)
    wv2, bv2 = orthogonal_linear(ks[2], h_last, 1)
    wa1, ba1 = orthogonal_linear(ks[3], h_shared, h_last)
    wa2, ba2 = orthogonal_linear(ks[4], h_last, action_space_size)
    return dict(w1=w1, b1=b1, wv1=wv1, bv1=bv1, wv2=wv2, bv2=bv2,
                wa1=wa1, ba1=ba1, wa2=wa2, ba2=ba2,
                action_space_size=action_space_size)


def pack_kernel_params(params, *, lane_pad=128):
    """Fuse value/advantage weights, fold the dueling combine into the output
    matmul, pad the output width to a lane-dense multiple of 128, and cast
    matmul weights to bf16 (biases stay f32)."""
    A = params["action_space_size"]
    P = _round_up(max(A, 1), lane_pad)

    # Stage 1 fusion: [hv | ha] from a single (H, 2H) matmul.
    wva1 = jnp.concatenate([params["wv1"], params["wa1"]], axis=1)
    bva1 = jnp.concatenate([params["bv1"], params["ba1"]], axis=1)

    # Stage 2 fusion + dueling fold:
    #   Q = V + A - mean(A) = hv @ (wv2 @ 1_{1xA}) + ha @ (wa2 @ M) + bias
    # with M = I_A - (1/A) * 1_{AxA}.
    M = jnp.eye(A, dtype=jnp.float32) - jnp.full((A, A), 1.0 / A, jnp.float32)
    wq_v = params["wv2"] @ jnp.ones((1, A), jnp.float32)   # (H2, A)
    wq_a = params["wa2"] @ M                                # (H2, A)
    wq = jnp.concatenate([wq_v, wq_a], axis=0)              # (2*H2, A)
    bq = params["bv2"] * jnp.ones((1, A), jnp.float32) + params["ba2"] @ M

    # Lane-pad output so the final store is unmasked / lane-dense.
    wq = jnp.pad(wq, ((0, 0), (0, P - A)))
    bq = jnp.pad(bq, ((0, 0), (0, P - A)))

    return dict(
        w1=params["w1"].astype(jnp.bfloat16),
        b1=params["b1"],
        wva1=wva1.astype(jnp.bfloat16),
        bva1=bva1,
        wq=wq.astype(jnp.bfloat16),
        bq=bq,
        action_space_size=A,
    )


def reference_forward(features, params):
    """Pure-JAX f32 reference of the original module's forward (eval mode)."""
    h = jnp.maximum(features @ params["w1"] + params["b1"], 0.0)
    hv = jnp.maximum(h @ params["wv1"] + params["bv1"], 0.0)
    v = hv @ params["wv2"] + params["bv2"]
    ha = jnp.maximum(h @ params["wa1"] + params["ba1"], 0.0)
    a = ha @ params["wa2"] + params["ba2"]
    return v + a - jnp.mean(a, axis=1, keepdims=True)


if __name__ == "__main__":
    key = jax.random.PRNGKey(0)
    k_x, k_p = jax.random.split(key)

    batch = 8
    feature_dim = 128
    action_space_size = 8
    hidden_dims = (128, 128)

    params = make_params(k_p, feature_dim, action_space_size, hidden_dims)
    kparams = pack_kernel_params(params)
    features = jax.random.normal(k_x, (batch, feature_dim), dtype=jnp.float32)

    q = dueling_dqn_forward(features, kparams)
    q = jax.block_until_ready(q)

    q_ref = reference_forward(features, params)
    assert q.shape == (batch, action_space_size)
    max_err = float(jnp.max(jnp.abs(q - q_ref)))
    # bf16 matmul operands across 3 layers -> loose tolerance vs f32 reference.
    assert max_err < 1e-1, f"max abs err {max_err}"

    print("KERNEL_OK")
</pallas_src>

<mosaic_0001>
module attributes {stable_mosaic.version = 11 : i64} {
  func.func @dueling_dqn_kernel(%arg0: i32, %arg1: memref<8x128xbf16, #tpu.memory_space<vmem>>, %arg2: memref<128x128xbf16, #tpu.memory_space<vmem>>, %arg3: memref<1x128xf32, #tpu.memory_space<vmem>>, %arg4: memref<128x256xbf16, #tpu.memory_space<vmem>>, %arg5: memref<1x256xf32, #tpu.memory_space<vmem>>, %arg6: memref<256x128xbf16, #tpu.memory_space<vmem>>, %arg7: memref<1x128xf32, #tpu.memory_space<vmem>>, %arg8: memref<8x128xf32, #tpu.memory_space<vmem>>) attributes {dimension_semantics = [#tpu.dimension_semantics<parallel>], iteration_bounds = array<i64: 1>, scalar_prefetch = 0 : i64, scratch_operands = 0 : i64, tpu.core_type = #tpu.core_type<tc>, window_params = [{transform_indices = @transform_0, window_bounds = array<i64: 8, 128>}, {pipeline_mode = #tpu.pipeline_mode<synchronous>, transform_indices = @transform_1, window_bounds = array<i64: 128, 128>}, {pipeline_mode = #tpu.pipeline_mode<synchronous>, transform_indices = @transform_2, window_bounds = array<i64: 1, 128>}, {pipeline_mode = #tpu.pipeline_mode<synchronous>, transform_indices = @transform_3, window_bounds = array<i64: 128, 256>}, {pipeline_mode = #tpu.pipeline_mode<synchronous>, transform_indices = @transform_4, window_bounds = array<i64: 1, 256>}, {pipeline_mode = #tpu.pipeline_mode<synchronous>, transform_indices = @transform_5, window_bounds = array<i64: 256, 128>}, {pipeline_mode = #tpu.pipeline_mode<synchronous>, transform_indices = @transform_6, window_bounds = array<i64: 1, 128>}, {transform_indices = @transform_7, window_bounds = array<i64: 8, 128>}]} {
    %c0 = arith.constant 0 : index
    %c0_0 = arith.constant 0 : index
    %0 = vector.load %arg1[%c0, %c0_0] : memref<8x128xbf16, #tpu.memory_space<vmem>>, vector<8x128xbf16>
    %c0_1 = arith.constant 0 : index
    %c0_2 = arith.constant 0 : index
    %1 = vector.load %arg2[%c0_1, %c0_2] : memref<128x128xbf16, #tpu.memory_space<vmem>>, vector<128x128xbf16>
    %cst = arith.constant dense<0.000000e+00> : vector<8x128xf32>
    %2 = tpu.matmul %0, %1, %cst {dimension_numbers = #tpu.dot_dimension_numbers<[1], [0], [0], [1], [0, 0, 1, 1], [], []>} : vector<8x128xbf16>, vector<128x128xbf16>, vector<8x128xf32> -> vector<8x128xf32>
    %c0_3 = arith.constant 0 : index
    %c0_4 = arith.constant 0 : index
    %3 = vector.load %arg3[%c0_3, %c0_4] : memref<1x128xf32, #tpu.memory_space<vmem>>, vector<1x128xf32>
    %4 = vector.broadcast %3 : vector<1x128xf32> to vector<8x128xf32>
    %5 = arith.addf %2, %4 : vector<8x128xf32>
    %cst_5 = arith.constant 0.000000e+00 : f32
    %6 = vector.broadcast %cst_5 : f32 to vector<8x128xf32>
    %7 = arith.maximumf %5, %6 : vector<8x128xf32>
    %8 = arith.truncf %7 : vector<8x128xf32> to vector<8x128xbf16>
    %c0_6 = arith.constant 0 : index
    %c0_7 = arith.constant 0 : index
    %9 = vector.load %arg4[%c0_6, %c0_7] : memref<128x256xbf16, #tpu.memory_space<vmem>>, vector<128x256xbf16>
    %cst_8 = arith.constant dense<0.000000e+00> : vector<8x256xf32>
    %10 = tpu.matmul %8, %9, %cst_8 {dimension_numbers = #tpu.dot_dimension_numbers<[1], [0], [0], [1], [0, 0, 1, 1], [], []>} : vector<8x128xbf16>, vector<128x256xbf16>, vector<8x256xf32> -> vector<8x256xf32>
    %c0_9 = arith.constant 0 : index
    %c0_10 = arith.constant 0 : index
    %11 = vector.load %arg5[%c0_9, %c0_10] : memref<1x256xf32, #tpu.memory_space<vmem>>, vector<1x256xf32>
    %12 = vector.broadcast %11 : vector<1x256xf32> to vector<8x256xf32>
    %13 = arith.addf %10, %12 : vector<8x256xf32>
    %cst_11 = arith.constant 0.000000e+00 : f32
    %14 = vector.broadcast %cst_11 : f32 to vector<8x256xf32>
    %15 = arith.maximumf %13, %14 : vector<8x256xf32>
    %16 = arith.truncf %15 : vector<8x256xf32> to vector<8x256xbf16>
    %c0_12 = arith.constant 0 : index
    %c0_13 = arith.constant 0 : index
    %17 = vector.load %arg6[%c0_12, %c0_13] : memref<256x128xbf16, #tpu.memory_space<vmem>>, vector<256x128xbf16>
    %cst_14 = arith.constant dense<0.000000e+00> : vector<8x128xf32>
    %18 = tpu.matmul %16, %17, %cst_14 {dimension_numbers = #tpu.dot_dimension_numbers<[1], [0], [0], [1], [0, 0, 1, 1], [], []>} : vector<8x256xbf16>, vector<256x128xbf16>, vector<8x128xf32> -> vector<8x128xf32>
    %c0_15 = arith.constant 0 : index
    %c0_16 = arith.constant 0 : index
    %19 = vector.load %arg7[%c0_15, %c0_16] : memref<1x128xf32, #tpu.memory_space<vmem>>, vector<1x128xf32>
    %20 = vector.broadcast %19 : vector<1x128xf32> to vector<8x128xf32>
    %21 = arith.addf %18, %20 : vector<8x128xf32>
    %c0_17 = arith.constant 0 : index
    %c0_18 = arith.constant 0 : index
    %22 = vector.load %arg8[%c0_17, %c0_18] : memref<8x128xf32, #tpu.memory_space<vmem>>, vector<8x128xf32>
    tpu.vector_store %arg8[%c0_17, %c0_18], %21 {strides = array<i32>} : memref<8x128xf32, #tpu.memory_space<vmem>>, vector<8x128xf32>,
    return
  }
  func.func @transform_0(%arg0: i32) -> (i32, i32) {
    %c0_i32 = arith.constant 0 : i32
    %c0_i32_0 = arith.constant 0 : i32
    return %arg0, %c0_i32 : i32, i32
  }
  func.func @transform_1(%arg0: i32) -> (i32, i32) {
    %c0_i32 = arith.constant 0 : i32
    %c0_i32_0 = arith.constant 0 : i32
    %c0_i32_1 = arith.constant 0 : i32
    return %c0_i32, %c0_i32_0 : i32, i32
  }
  func.func @transform_2(%arg0: i32) -> (i32, i32) {
    %c0_i32 = arith.constant 0 : i32
    %c0_i32_0 = arith.constant 0 : i32
    %c0_i32_1 = arith.constant 0 : i32
    return %c0_i32, %c0_i32_0 : i32, i32
  }
  func.func @transform_3(%arg0: i32) -> (i32, i32) {
    %c0_i32 = arith.constant 0 : i32
    %c0_i32_0 = arith.constant 0 : i32
    %c0_i32_1 = arith.constant 0 : i32
    return %c0_i32, %c0_i32_0 : i32, i32
  }
  func.func @transform_4(%arg0: i32) -> (i32, i32) {
    %c0_i32 = arith.constant 0 : i32
    %c0_i32_0 = arith.constant 0 : i32
    %c0_i32_1 = arith.constant 0 : i32
    return %c0_i32, %c0_i32_0 : i32, i32
  }
  func.func @transform_5(%arg0: i32) -> (i32, i32) {
    %c0_i32 = arith.constant 0 : i32
    %c0_i32_0 = arith.constant 0 : i32
    %c0_i32_1 = arith.constant 0 : i32
    return %c0_i32, %c0_i32_0 : i32, i32
  }
  func.func @transform_6(%arg0: i32) -> (i32, i32) {
    %c0_i32 = arith.constant 0 : i32
    %c0_i32_0 = arith.constant 0 : i32
    %c0_i32_1 = arith.constant 0 : i32
    return %c0_i32, %c0_i32_0 : i32, i32
  }
  func.func @transform_7(%arg0: i32) -> (i32, i32) {
    %c0_i32 = arith.constant 0 : i32
    %c0_i32_0 = arith.constant 0 : i32
    return %arg0, %c0_i32 : i32, i32
  }
}

</mosaic_0001>

<bundles_post_ra>
// kernel: tpu_custom_call.1
= control target key start
LH: loop header
LB: loop body
LE: loop exit
PB: predicated region body
PF: predicated region fallthrough
CT: control target
= control target key end

     0   :  { %12 = vsyncpa [#allocation3], 0  ;;  %s884_s0 = inlined_call_operand.hbm [shape: bf16[8,128], index: 0, kind: input, shape index: {}]   ;;  %s885_s1 = inlined_call_operand.hbm [shape: bf16[128,128], index: 1, kind: input, shape index: {}]   ;;  %s886_s2 = inlined_call_operand.vmem [shape: f32[1,128], index: 2, kind: input, shape index: {}]   ;;  %s887_s3 = inlined_call_operand.hbm [shape: bf16[128,256], index: 3, kind: input, shape index: {}]   ;;  %s888_s4 = inlined_call_operand.vmem [shape: f32[1,256], index: 4, kind: input, shape index: {}]   ;;  %s889_s5 = inlined_call_operand.hbm [shape: bf16[256,128], index: 5, kind: input, shape index: {}]   ;;  %s890_s6 = inlined_call_operand.vmem [shape: f32[1,128], index: 6, kind: input, shape index: {}]   ;;  %s891_s7 = inlined_call_operand.hbm [shape: f32[8,128], index: 7, kind: output, shape index: {}]  }
   0x1   :  { %13 = vsyncpa [#allocation6], 0 }
   0x2   :  { %14 = vsyncpa [#allocation9], 0 }
   0x3   :  { %15 = vsyncpa [#allocation4], 0  ;;  %s802_s24 = smov [#allocation5]  }
   0x4   :  { %s31_s25 = sshll.u32 %s802_s24, 4  ;;  %s32_s25 = int_to_ptr.vmem [resolvable:$true] %s31_s25 }
   0x5   :  { %s702_s26 = scalar_lea.vmem %s32_s25, 1024  ;;  %p707_p1 = scmp.lt.s32.totalorder %s32_s25, %s32_s25 }
   0x6   :  { %p703_p0 = scmp.ne.s32.totalorder %s32_s25, %s702_s26  ;;  %p708_p2 = scmp.lt.s32.totalorder %s702_s26, %s702_s26 }
   0x8   :  { %p709_p3 = por %p708_p2, %p707_p1 }
   0xa   :  { %p710_p4 = pnand %p709_p3, %p703_p0 }
   0xc   :  { %713 = shalt.err (!%p710_p4)
}
   0xd   :  { %s803_s27 = smov 64   ;;  %s804_s28 = smov 4  }
   0xe   :  { %37 = dma.hbm_to_vmem [thread:$0]  %s885_s1, 1024, %s32_s25, [#allocation6], %s803_s27, %s803_s27, %s804_s28  }
   0xf   :  { %s805_s8 = smov [#allocation2]   ;;  %s806_s10 = smov [#allocation7]  }
  0x10   :  { %s22_s9 = sshll.u32 %s805_s8, 4  ;;  %s45_s11 = sshll.u32 %s806_s10, 4  ;;  %s23_s9 = int_to_ptr.vmem [resolvable:$true] %s22_s9  ;;  %s46_s11 = int_to_ptr.vmem [resolvable:$true] %s45_s11 }
  0x11   :  { %s722_s12 = scalar_lea.vmem %s23_s9, 64  ;;  %p727_p6 = scmp.lt.s32.totalorder %s23_s9, %s23_s9 }
  0x12   :  { %p723_p5 = scmp.ne.s32.totalorder %s23_s9, %s722_s12  ;;  %p728_p7 = scmp.lt.s32.totalorder %s722_s12, %s722_s12 }
  0x14   :  { %p729_p8 = por %p728_p7, %p727_p6 }
  0x16   :  { %p730_p9 = pnand %p729_p8, %p723_p5 }
  0x18   :  { %733 = shalt.err (!%p730_p9)
}
  0x19   :  { %25 = dma.hbm_to_vmem [thread:$0]  %s884_s0, 64, %s23_s9, [#allocation3]  }
  0x1a   :  { %s742_s15 = scalar_lea.vmem %s46_s11, 2048  ;;  %p747_p11 = scmp.lt.s32.totalorder %s46_s11, %s46_s11 }
  0x1b   :  { %p743_p10 = scmp.ne.s32.totalorder %s46_s11, %s742_s15  ;;  %p748_p12 = scmp.lt.s32.totalorder %s742_s15, %s742_s15 }
  0x1d   :  { %p749_p13 = por %p748_p12, %p747_p11 }
  0x1f   :  { %p750_p0 = pnand %p749_p13, %p743_p10 }
  0x21   :  { %753 = shalt.err (!%p750_p0)
}
  0x22   :  { %s807_s1 = smov 128   ;;  %s808_s16 = smov 8  }
  0x23   :  { %51 = dma.hbm_to_vmem [thread:$0]  %s887_s3, 2048, %s46_s11, [#allocation6], %s807_s1, %s807_s1, %s808_s16  }
  0x24   :  { %s809_s19 = smov [#allocation8]  }
  0x25   :  { %s59_s20 = sshll.u32 %s809_s19, 4  ;;  %s60_s20 = int_to_ptr.vmem [resolvable:$true] %s59_s20 }
  0x26   :  { %s762_s21 = scalar_lea.vmem %s60_s20, 2048  ;;  %p767_p2 = scmp.lt.s32.totalorder %s60_s20, %s60_s20 }
  0x27   :  { %p763_p1 = scmp.ne.s32.totalorder %s60_s20, %s762_s21  ;;  %p768_p3 = scmp.lt.s32.totalorder %s762_s21, %s762_s21 }
  0x29   :  { %p769_p4 = por %p768_p3, %p767_p2 }
  0x2b   :  { %p770_p5 = pnand %p769_p4, %p763_p1 }
  0x2d   :  { %773 = shalt.err (!%p770_p5)
}
  0x2e   :  { %65 = dma.hbm_to_vmem [thread:$0]  %s889_s5, 2048, %s60_s20, [#allocation9], %s803_s27, %s803_s27, %s804_s28  }
  0x2f   :  { %794 = dma.done.wait [#allocation3], 64  }
  0x30   :  { %795 = vsyncadd [#allocation3], 4294967232 }
  0x31   :  { %796 = dma.done.wait [#allocation6], 3072  }
  0x32   :  { %797 = vsyncadd [#allocation6], 4294964224 }
  0x33   :  { %798 = dma.done.wait [#allocation9], 2048  }
  0x34   :  { %799 = vsyncadd [#allocation9], 4294965248  ;;  %v810_v0 = vmov 0.0   ;;  %vm811_vm0 = vmmov 0   ;;  %v646_v1 = vld [vmem:[#allocation5 + $0x38] sm:$0xff]   ;;  %v647_v2 = vld [vmem:[#allocation5 + $0x30] sm:$0xff]   ;;  %v213_v51 = vlaneseq }
  0x35   :  { %614 = vmatprep.subr.bf16.mxu0 %v810_v0  ;;  %630 = vmatprep.mubr.msk.bf16.mxu0 %vm811_vm0, %v810_v0  ;;  %v648_v3 = vld [vmem:[#allocation5 + $0x28] sm:$0xff]   ;;  %v654_v4 = vld [vmem:[#allocation7 + $0x74] ss:$8 sps:$4 sm:$0xff]   ;;  %v656_v5 = vld [vmem:[#allocation7 + $0x70] ss:$8 sps:$4 sm:$0xff]   ;;  %v812_v26 = vmov 0  }
  0x36   :  { %615 = vmatpush3.bf16.msra.mxu0 %v646_v1  ;;  %v649_v6 = vld [vmem:[#allocation5 + $0x20] sm:$0xff]   ;;  %303 = vmatprep.subr.bf16.mxu1 %v654_v4  ;;  %v660_v9 = vld [vmem:[#allocation7 + $0x54] ss:$8 sps:$4 sm:$0xff]   ;;  %v662_v11 = vld [vmem:[#allocation7 + $0x50] ss:$8 sps:$4 sm:$0xff]   ;;  %v214_v52 = vshrl.u32 %v213_v51, 7 }
  0x37   :  { %616 = vmatprep.subr.bf16.mxu0 %v810_v0  ;;  %v657_v7 = vld [vmem:[#allocation7 + $0x64] ss:$8 sps:$4 sm:$0xff]   ;;  %304 = vmatpush1.bf16.msra.mxu1 %v656_v5  ;;  %v659_v8 = vld [vmem:[#allocation7 + $0x60] ss:$8 sps:$4 sm:$0xff]   ;;  %v650_v10 = vld [vmem:[#allocation5 + $0x18] sm:$0xff]  }
  0x38   :  { %305 = vmatprep.subr.bf16.mxu1 %v657_v7  ;;  %v651_v12 = vld [vmem:[#allocation5 + $0x10] sm:$0xff]   ;;  %v663_v13 = vld [vmem:[#allocation7 + $0x44] ss:$8 sps:$4 sm:$0xff]   ;;  %v665_v14 = vld [vmem:[#allocation7 + $0x40] ss:$8 sps:$4 sm:$0xff]   ;;  %335 = vmatprep.mubr.bf16.mxu1 %v812_v26  ;;  %v215_v53 = vsub.s32 0, %v214_v52 }
  0x39   :  { %v666_v15 = vld [vmem:[#allocation7 + $0x34] ss:$8 sps:$4 sm:$0xff]   ;;  %v652_v16 = vld [vmem:[#allocation5 + $0x8] sm:$0xff]   ;;  %v668_v17 = vld [vmem:[#allocation7 + $0x30] ss:$8 sps:$4 sm:$0xff]   ;;  %v219_v55 = vsub.s32 1, %v214_v52 }
  0x3a   :  { %617 = vmatpush3.bf16.msra.mxu0 %v647_v2  ;;  %v669_v18 = vld [vmem:[#allocation7 + $0x24] ss:$8 sps:$4 sm:$0xff]   ;;  %v671_v20 = vld [vmem:[#allocation7 + $0x20] ss:$8 sps:$4 sm:$0xff]   ;;  %v672_v21 = vld [vmem:[#allocation7 + $0x14] ss:$8 sps:$4 sm:$0xff]  }
  0x3b   :  { %618 = vmatprep.subr.bf16.mxu0 %v810_v0  ;;  %306 = vmatpush1.bf16.msra.mxu1 %v659_v8  ;;  %v653_v19 = vld [vmem:[#allocation5] sm:$0xff]   ;;  %v81_v22 = vld [vmem:[#allocation2] sm:$0xf]  ;;  %v674_v23 = vld [vmem:[#allocation7 + $0x10] ss:$8 sps:$4 sm:$0xff]  }
  0x3c   :  { %307 = vmatprep.subr.bf16.mxu1 %v660_v9  ;;  %v675_v24 = vld [vmem:[#allocation7 + $0x4] ss:$8 sps:$4 sm:$0xff]   ;;  %v677_v25 = vld [vmem:[#allocation7] ss:$8 sps:$4 sm:$0xff]   ;;  %v678_v27 = vld [vmem:[#allocation8 + $0x78] sm:$0xff]  }
  0x3d   :  { %v679_v28 = vld [vmem:[#allocation8 + $0x38] sm:$0xff]   ;;  %v680_v29 = vld [vmem:[#allocation8 + $0x70] sm:$0xff]   ;;  %v682_v31 = vld [vmem:[#allocation8 + $0x68] sm:$0xff]  }
  0x3e   :  { %619 = vmatpush3.bf16.msra.mxu0 %v648_v3  ;;  %v681_v30 = vld [vmem:[#allocation8 + $0x30] sm:$0xff]   ;;  %v683_v32 = vld [vmem:[#allocation8 + $0x28] sm:$0xff]   ;;  %v684_v33 = vld [vmem:[#allocation8 + $0x60] sm:$0xff]  }
  0x3f   :  { %620 = vmatprep.subr.bf16.mxu0 %v810_v0  ;;  %308 = vmatpush1.bf16.msra.mxu1 %v662_v11  ;;  %v685_v34 = vld [vmem:[#allocation8 + $0x20] sm:$0xff]   ;;  %v686_v35 = vld [vmem:[#allocation8 + $0x58] sm:$0xff]   ;;  %v688_v37 = vld [vmem:[#allocation8 + $0x50] sm:$0xff]  }
  0x40   :  { %309 = vmatprep.subr.bf16.mxu1 %v663_v13  ;;  %v687_v36 = vld [vmem:[#allocation8 + $0x18] sm:$0xff]   ;;  %v689_v38 = vld [vmem:[#allocation8 + $0x10] sm:$0xff]   ;;  %v690_v47 = vld [vmem:[#allocation8 + $0x48] sm:$0xff]  }
  0x41   :  { %v541_v39 = vld [vmem:[%s886_s2] ss:$0 sm:$0xff]  ;;  %v691_v48 = vld [vmem:[#allocation8 + $0x8] sm:$0xff]   ;;  %v692_v49 = vld [vmem:[#allocation8 + $0x40] sm:$0xff]  }
  0x42   :  { %621 = vmatpush3.bf16.msra.mxu0 %v649_v6  ;;  %v693_v50 = vld [vmem:[#allocation8] sm:$0xff]   ;;  %v211_v54 = vld [vmem:[%s888_s4] sm:$0x3]  ;;  %s813_s4 = smov [#allocation10]  }
  0x43   :  { %622 = vmatprep.subr.bf16.mxu0 %v810_v0  ;;  %310 = vmatpush1.bf16.msra.mxu1 %v665_v14  ;;  %v216_v56 = vrot.slane %v211_v54, %v215_v53  ;;  %v220_v57 = vrot.slane %v211_v54, %v219_v55  ;;  %v566_v5 = vld [vmem:[%s890_s6] ss:$0 sm:$0xff]  ;;  %s530_s26 = sshll.u32 %s813_s4, 4  ;;  %s531_s26 = int_to_ptr.vmem [resolvable:$true] %s530_s26 }
  0x44   :  { %311 = vmatprep.subr.bf16.mxu1 %v666_v15  ;;  %s774_s27 = scalar_lea.vmem %s531_s26, 128  ;;  %p779_p7 = scmp.lt.s32.totalorder %s531_s26, %s531_s26 }
  0x45   :  { %p775_p6 = scmp.ne.s32.totalorder %s531_s26, %s774_s27  ;;  %p780_p8 = scmp.lt.s32.totalorder %s774_s27, %s774_s27 }
  0x46   :  { %623 = vmatpush3.bf16.msra.mxu0 %v650_v10 }
  0x47   :  { %624 = vmatprep.subr.bf16.mxu0 %v810_v0  ;;  %312 = vmatpush1.bf16.msra.mxu1 %v668_v17  ;;  %p781_p9 = por %p780_p8, %p779_p7 }
  0x48   :  { %313 = vmatprep.subr.bf16.mxu1 %v669_v18 }
  0x49   :  { %p782_p10 = pnand %p781_p9, %p775_p6 }
  0x4a   :  { %625 = vmatpush3.bf16.msra.mxu0 %v651_v12 }
  0x4b   :  { %626 = vmatprep.subr.bf16.mxu0 %v810_v0  ;;  %314 = vmatpush1.bf16.msra.mxu1 %v671_v20 }
  0x4c   :  { %315 = vmatprep.subr.bf16.mxu1 %v672_v21 }
  0x4e   :  { %627 = vmatpush3.bf16.msra.mxu0 %v652_v16 }
  0x4f   :  { %628 = vmatprep.subr.bf16.mxu0 %v810_v0  ;;  %316 = vmatpush1.bf16.msra.mxu1 %v674_v23 }
  0x50   :  { %317 = vmatprep.subr.bf16.mxu1 %v675_v24 }
  0x52   :  { %629 = vmatpush3.bf16.msra.mxu0 %v653_v19 }
  0x53   :  { %318 = vmatpush1.bf16.msra.mxu1 %v677_v25  ;;  %592 = vmatprep.subr.bf16.mxu0 %v678_v27 }
  0x55   :  { %631 = vmatmul.mubr.bf16.vlgmr.msra.gmra.mxu0 %v81_v22 }
  0x56   :  { %593 = vmatpush3.bf16.msra.mxu0 %v679_v28 }
  0x57   :  { %594 = vmatprep.subr.bf16.mxu0 %v680_v29 }
  0x5a   :  { %595 = vmatpush3.bf16.msra.mxu0 %v681_v30 }
  0x5b   :  { %596 = vmatprep.subr.bf16.mxu0 %v682_v31 }
  0x5e   :  { %597 = vmatpush3.bf16.msra.mxu0 %v683_v32 }
  0x5f   :  { %598 = vmatprep.subr.bf16.mxu0 %v684_v33 }
  0x62   :  { %599 = vmatpush3.bf16.msra.mxu0 %v685_v34 }
  0x63   :  { %600 = vmatprep.subr.bf16.mxu0 %v686_v35 }
  0x66   :  { %601 = vmatpush3.bf16.msra.mxu0 %v687_v36 }
  0x67   :  { %602 = vmatprep.subr.bf16.mxu0 %v688_v37 }
  0x6a   :  { %603 = vmatpush3.bf16.msra.mxu0 %v689_v38 }
  0x6b   :  { %604 = vmatprep.subr.bf16.mxu0 %v690_v47 }
  0x6e   :  { %605 = vmatpush3.bf16.msra.mxu0 %v691_v48 }
  0x6f   :  { %606 = vmatprep.subr.bf16.mxu0 %v692_v49 }
  0x72   :  { %607 = vmatpush3.bf16.msra.mxu0 %v693_v50 }
 0x115   :  { %v187_v40 = vpop.f32.mrf.mxu0 }
 0x116   :  { %v188_v41 = vadd.f32 %v541_v39, %v187_v40 }
 0x117   :  { %v632_v42 = vpop.f32.mrf.mxu0 }
 0x118   :  { %v193_v43 = vmax.f32 %v188_v41, 0.0 }
 0x119   :  { %v190_v44 = vpop.f32.mrf.mxu0 }
 0x11a   :  { %v194_v45 = vpack.c.bf16 %v193_v43, %v193_v43 }
 0x11b   :  { %v633_v46 = vpop.f32.mrf.mxu0 }
 0x11c   :  { %336 = vmatmul.mubr.bf16.vlgmr.msra.gmra.mxu1 %v194_v45 }
 0x1dc   :  { %v337_v58 = vpop.f32.mrf.mxu1 }
 0x1dd   :  { %v338_v59 = vadd.f32 %v337_v58, %v216_v56 }
 0x1de   :  { %v339_v60 = vpop.f32.mrf.mxu1 }
 0x1df   :  { %v340_v61 = vadd.f32 %v339_v60, %v220_v57  ;;  %v344_v62 = vmax.f32 %v338_v59, 0.0 }
 0x1e0   :  { %v341_v63 = vpop.f32.mrf.mxu1 }
 0x1e1   :  { %v345_v0 = vmax.f32 %v340_v61, 0.0  ;;  %v346_v3 = vpack.c.bf16 %v344_v62, %v344_v62 }
 0x1e2   :  { %v342_v1 = vpop.f32.mrf.mxu1 }
 0x1e3   :  { %v347_v2 = vpack.c.bf16 %v345_v0, %v345_v0 }
 0x1e5   :  { %515 = vmatprep.mubr.bf16.mxu0 %v347_v2 }
 0x1e6   :  { %516 = vmatmul.mubr.bf16.vlgmr.msra.gmra.mxu0 %v346_v3 }
 0x2a6   :  { %v608_v4 = vpop.f32.mrf.mxu0 }
 0x2a8   :  { %v609_v6 = vpop.f32.mrf.mxu0 }
 0x2a9   :  { %v610_v7 = vadd.f32 %v609_v6, %v608_v4 }
 0x2aa   :  { %v611_v8 = vpop.f32.mrf.mxu0 }
 0x2ab   :  { %v518_v9 = vadd.f32 %v610_v7, %v566_v5 }
 0x2ac   :  { %v612_v10 = vpop.f32.mrf.mxu0 }
 0x2ad   :  { %523 = vst [vmem:[#allocation10] sm:$0xff] %v518_v9 }
 0x2ae   :  { %785 = shalt.err (!%p782_p10)
}
 0x2af   :  { %533 = dma.vmem_to_hbm [thread:$0]  %s531_s26, 128, %s891_s7, [#allocation4]  }
 0x2b0   :  { %800 = dma.done.wait [#allocation4], 128  }
 0x2b1   :  { %801 = vsyncadd [#allocation4], 4294967168 }
 0x2b2   :  { %537 = vsyncpa [#allocation3], 1 }
 0x2b3   :  { %538 = vsyncpa [#allocation6], 1 }
 0x2b4   :  { %539 = vsyncpa [#allocation9], 1 }
 0x2b5   :  { %540 = vsyncpa [#allocation4], 1 }

</bundles_post_ra>
